<compile_context>
chip_gen: v5e
topology: v5e:2x2
jax: 0.10.0
libtpu: 0.0.40
codegen_flags: <defaults>
</compile_context>

<pallas_src>
import jax
import jax.numpy as jnp
from jax.experimental import pallas as pl
from jax.experimental.pallas import tpu as pltpu


# -----------------------------------------------------------------------------
# Small helpers
# -----------------------------------------------------------------------------
def _round_up(x, m):
    return (x + m - 1) // m * m


def _pad_rows(x, target):
    if x.shape[0] == target:
        return x
    pads = [(0, target - x.shape[0])] + [(0, 0)] * (x.ndim - 1)
    return jnp.pad(x, pads)


def _pad_to(x, shape):
    pads = [(0, t - s) for s, t in zip(x.shape, shape)]
    return jnp.pad(x, pads)


_VMEM_LIMIT = 32 * 1024 * 1024  # size from Rb / weight tiles at production scale


# -----------------------------------------------------------------------------
# Kernel 1: 1x1 conv (C -> reduce_dim) as an M-tiled matmul
# -----------------------------------------------------------------------------
def _linear_kernel(x_ref, w_ref, b_ref, o_ref):
    x = x_ref[...].astype(jnp.bfloat16)
    y = jnp.dot(x, w_ref[...], preferred_element_type=jnp.float32) + b_ref[...]
    o_ref[...] = y


def pallas_linear(x, w, b, *, tile_m):
    M, K = x.shape
    N = w.shape[1]
    assert M % tile_m == 0
    return pl.pallas_call(
        _linear_kernel,
        out_shape=jax.ShapeDtypeStruct((M, N), jnp.float32),
        grid=(M // tile_m,),
        in_specs=[
            pl.BlockSpec((tile_m, K), lambda i: (i, 0)),
            pl.BlockSpec((K, N), lambda i: (0, 0)),
            pl.BlockSpec((1, N), lambda i: (0, 0)),
        ],
        out_specs=pl.BlockSpec((tile_m, N), lambda i: (i, 0)),
        compiler_params=pltpu.CompilerParams(dimension_semantics=("parallel",)),
    )(x, w, b.reshape(1, N))


# -----------------------------------------------------------------------------
# Kernel 2: fused object head
#   h1 = relu(x @ rfo_w1 + b1)   (K-tiled, f32 accumulator)
#   h2 = relu(h1 @ rfo_w2 + b2)
#   out = h2 @ [obj_compress | post_obj] + bias   (lane-padded head slab)
# -----------------------------------------------------------------------------
def _obj_head_kernel(x_ref, w1_ref, b1_ref, w2_ref, b2_ref, wh_ref, bh_ref,
                     o_ref, acc_ref):
    k = pl.program_id(1)

    @pl.when(k == 0)
    def _():
        acc_ref[...] = jnp.zeros_like(acc_ref)

    x = x_ref[...].astype(jnp.bfloat16)
    acc_ref[...] += jnp.dot(x, w1_ref[...], preferred_element_type=jnp.float32)

    @pl.when(k == pl.num_programs(1) - 1)
    def _():
        h1 = jnp.maximum(acc_ref[...] + b1_ref[...], 0.0)
        h2 = jnp.dot(h1.astype(jnp.bfloat16), w2_ref[...],
                     preferred_element_type=jnp.float32) + b2_ref[...]
        h2 = jnp.maximum(h2, 0.0)
        o_ref[...] = (jnp.dot(h2.astype(jnp.bfloat16), wh_ref[...],
                              preferred_element_type=jnp.float32) + bh_ref[...])


def pallas_obj_head(x, w1, b1, w2, b2, wh, bh, *, tile_m, tile_k):
    M, K = x.shape
    PD = w1.shape[1]
    NH = wh.shape[1]
    assert M % tile_m == 0 and K % tile_k == 0
    # TODO(synk): at production scale (PD=4096) rfo_w2/head_w also need N-tiling
    # (double-buffered 32 MiB bf16 blocks overflow v7x's 64 MiB VMEM).
    return pl.pallas_call(
        _obj_head_kernel,
        out_shape=jax.ShapeDtypeStruct((M, NH), jnp.float32),
        grid=(M // tile_m, K // tile_k),
        in_specs=[
            pl.BlockSpec((tile_m, tile_k), lambda m, k: (m, k)),
            pl.BlockSpec((tile_k, PD), lambda m, k: (k, 0)),
            pl.BlockSpec((1, PD), lambda m, k: (0, 0)),
            pl.BlockSpec((PD, PD), lambda m, k: (0, 0)),
            pl.BlockSpec((1, PD), lambda m, k: (0, 0)),
            pl.BlockSpec((PD, NH), lambda m, k: (0, 0)),
            pl.BlockSpec((1, NH), lambda m, k: (0, 0)),
        ],
        out_specs=pl.BlockSpec((tile_m, NH), lambda m, k: (m, 0)),
        scratch_shapes=[pltpu.VMEM((tile_m, PD), jnp.float32)],
        compiler_params=pltpu.CompilerParams(
            dimension_semantics=("parallel", "arbitrary"),
            vmem_limit_bytes=_VMEM_LIMIT),
    )(x, w1, b1.reshape(1, -1), w2, b2.reshape(1, -1), wh, bh.reshape(1, -1))


# -----------------------------------------------------------------------------
# Kernel 3: fused relation head
#   h1 = relu(weighted_flat @ rf_w1w + O_flat @ rf_w1o + b1)   (K-tiled acc)
#   rel_input      = h1 @ rf_w2 + b2
#   last_rel_input = rel_input @ reduce_rel_input_w + b        (lane-padded)
# -----------------------------------------------------------------------------
def _rel_head_kernel(wf_ref, of_ref, w1w_ref, w1o_ref, b1_ref, w2_ref, b2_ref,
                     w3_ref, b3_ref, o_ref, acc_ref):
    k = pl.program_id(1)

    @pl.when(k == 0)
    def _():
        acc_ref[...] = jnp.zeros_like(acc_ref)

    wf = wf_ref[...].astype(jnp.bfloat16)
    of = of_ref[...].astype(jnp.bfloat16)
    acc_ref[...] += (
        jnp.dot(wf, w1w_ref[...], preferred_element_type=jnp.float32)
        + jnp.dot(of, w1o_ref[...], preferred_element_type=jnp.float32))

    @pl.when(k == pl.num_programs(1) - 1)
    def _():
        h1 = jnp.maximum(acc_ref[...] + b1_ref[...], 0.0)
        rel_in = jnp.dot(h1.astype(jnp.bfloat16), w2_ref[...],
                         preferred_element_type=jnp.float32) + b2_ref[...]
        o_ref[...] = (jnp.dot(rel_in.astype(jnp.bfloat16), w3_ref[...],
                              preferred_element_type=jnp.float32) + b3_ref[...])


def pallas_rel_head(wf, of, w1w, w1o, b1, w2, b2, w3, b3, *, tile_m, tile_k):
    M, K = wf.shape
    PD = w1w.shape[1]
    NO = w3.shape[1]
    assert M % tile_m == 0 and K % tile_k == 0
    return pl.pallas_call(
        _rel_head_kernel,
        out_shape=jax.ShapeDtypeStruct((M, NO), jnp.float32),
        grid=(M // tile_m, K // tile_k),
        in_specs=[
            pl.BlockSpec((tile_m, tile_k), lambda m, k: (m, k)),
            pl.BlockSpec((tile_m, tile_k), lambda m, k: (m, k)),
            pl.BlockSpec((tile_k, PD), lambda m, k: (k, 0)),
            pl.BlockSpec((tile_k, PD), lambda m, k: (k, 0)),
            pl.BlockSpec((1, PD), lambda m, k: (0, 0)),
            pl.BlockSpec((PD, PD), lambda m, k: (0, 0)),
            pl.BlockSpec((1, PD), lambda m, k: (0, 0)),
            pl.BlockSpec((PD, NO), lambda m, k: (0, 0)),
            pl.BlockSpec((1, NO), lambda m, k: (0, 0)),
        ],
        out_specs=pl.BlockSpec((tile_m, NO), lambda m, k: (m, 0)),
        scratch_shapes=[pltpu.VMEM((tile_m, PD), jnp.float32)],
        compiler_params=pltpu.CompilerParams(
            dimension_semantics=("parallel", "arbitrary"),
            vmem_limit_bytes=_VMEM_LIMIT),
    )(wf, of, w1w, w1o, b1.reshape(1, -1), w2, b2.reshape(1, -1), w3,
      b3.reshape(1, -1))


# -----------------------------------------------------------------------------
# Kernel 4: dynamic-filter attention (debug_type='test1_1'), Rb relations / step
#   logits[r, j, i] = w2 . relu(S[r,i] @ W1s + O[r,j] @ W1o + b1)   (b2 dropped:
#                     softmax over i is shift-invariant)
#   scores = softmax over i (lane axis)   ;   weighted[r, j] = scores[r, j] @ S[r]
#   (the O passthrough half of the PyTorch concat is NOT copied here)
# -----------------------------------------------------------------------------
def _dynfilter_kernel(s_ref, o_ref, w1s_ref, w1o_ref, b1_ref, w2_ref, out_ref):
    Rb, P2, D = s_ref.shape
    H = w1s_ref.shape[1]
    S = s_ref[...]                                              # [Rb, P2, D]
    O = o_ref[...]
    hs = jnp.dot(S.reshape(Rb * P2, D), w1s_ref[...],
                 preferred_element_type=jnp.float32).reshape(Rb, P2, H)
    ho = jnp.dot(O.reshape(Rb * P2, D), w1o_ref[...],
                 preferred_element_type=jnp.float32).reshape(Rb, P2, H)

    # transposed layout: j (object positions) on sublanes, i (subject) on lanes
    h = ho[:, :, None, :] + hs[:, None, :, :] + b1_ref[...]     # [Rb, P2j, P2i, H]
    h = jnp.maximum(h, 0.0)
    # TODO(synk): at production P2=49/H=256 push this H-contraction onto the MXU
    # (reshape to [Rb*P2*P2, H] @ [H, 1]); kept as a lane reduce here for robustness.
    logits = jnp.sum(h * w2_ref[...], axis=-1)                  # [Rb, P2j, P2i]

    # softmax over subject positions i == lane axis
    m = jnp.max(logits, axis=-1, keepdims=True)
    e = jnp.exp(logits - m)
    denom = jnp.sum(e, axis=-1, keepdims=True)
    scores = e * pl.reciprocal(denom, approx=True)              # [Rb, P2j, P2i]

    out_ref[...] = jnp.einsum('rji,rid->rjd', scores, S,
                              preferred_element_type=jnp.float32)


def pallas_dynfilter(S, O, w1s, w1o, b1, w2, *, rb):
    R, P2, D = S.shape
    H = w1s.shape[1]
    assert R % rb == 0
    return pl.pallas_call(
        _dynfilter_kernel,
        out_shape=jax.ShapeDtypeStruct((R, P2, D), jnp.float32),
        grid=(R // rb,),
        in_specs=[
            pl.BlockSpec((rb, P2, D), lambda r: (r, 0, 0)),
            pl.BlockSpec((rb, P2, D), lambda r: (r, 0, 0)),
            pl.BlockSpec((D, H), lambda r: (0, 0)),
            pl.BlockSpec((D, H), lambda r: (0, 0)),
            pl.BlockSpec((1, H), lambda r: (0, 0)),
            pl.BlockSpec((1, H), lambda r: (0, 0)),
        ],
        out_specs=pl.BlockSpec((rb, P2, D), lambda r: (r, 0, 0)),
        compiler_params=pltpu.CompilerParams(
            dimension_semantics=("parallel",),
            vmem_limit_bytes=_VMEM_LIMIT),
    )(S, O, w1s, w1o, b1.reshape(1, H), w2.reshape(1, H))


# -----------------------------------------------------------------------------
# Kernel 5: fused triple head
#   a = mapping_x(concat(sub_rep, obj_rep)) ; b = last_rel_input
#   triple = relu(a + b) - (a - b)^2
#   rel_logits = triple @ rel_compress + bias + freq_bias_rows   (lane-padded)
# -----------------------------------------------------------------------------
def _triple_head_kernel(so_ref, lri_ref, freq_ref, wmx_ref, bmx_ref,
                        wrc_ref, brc_ref, o_ref):
    a = jnp.dot(so_ref[...].astype(jnp.bfloat16), wmx_ref[...],
                preferred_element_type=jnp.float32) + bmx_ref[...]
    b = lri_ref[...]
    triple = jnp.maximum(a + b, 0.0) - jnp.square(a - b)
    o_ref[...] = (jnp.dot(triple, wrc_ref[...],
                          preferred_element_type=jnp.float32)
                  + brc_ref[...] + freq_ref[...])


def pallas_triple_head(so_rep, lri, freq_rows, wmx, bmx, wrc, brc, *, tile_m):
    M, K2 = so_rep.shape
    K3 = wmx.shape[1]
    NR = wrc.shape[1]
    assert M % tile_m == 0
    return pl.pallas_call(
        _triple_head_kernel,
        out_shape=jax.ShapeDtypeStruct((M, NR), jnp.float32),
        grid=(M // tile_m,),
        in_specs=[
            pl.BlockSpec((tile_m, K2), lambda m: (m, 0)),
            pl.BlockSpec((tile_m, K3), lambda m: (m, 0)),
            pl.BlockSpec((tile_m, NR), lambda m: (m, 0)),
            pl.BlockSpec((K2, K3), lambda m: (0, 0)),
            pl.BlockSpec((1, K3), lambda m: (0, 0)),
            pl.BlockSpec((K3, NR), lambda m: (0, 0)),
            pl.BlockSpec((1, NR), lambda m: (0, 0)),
        ],
        out_specs=pl.BlockSpec((tile_m, NR), lambda m: (m, 0)),
        compiler_params=pltpu.CompilerParams(dimension_semantics=("parallel",)),
    )(so_rep, lri, freq_rows, wmx, bmx.reshape(1, -1), wrc, brc.reshape(1, -1))


# -----------------------------------------------------------------------------
# Plain-JAX glue (data-dependent RoIAlign gather), NHWC output
# -----------------------------------------------------------------------------
def roi_align_nhwc(fmaps_hwc, rois, pool_size, spatial_scale):
    """Simple RoIAlign: one bilinear sample per bin center.  [B,H,W,C] -> [N,P,P,C]."""
    # TODO(synk): the original RoIAlignFunction uses sampling_ratio>1 samples and a
    # specific alignment convention; this is a single-sample-per-bin bilinear variant.
    B, H, W, C = fmaps_hwc.shape

    def one(roi):
        b = roi[0].astype(jnp.int32)
        x1, y1, x2, y2 = (roi[1] * spatial_scale, roi[2] * spatial_scale,
                          roi[3] * spatial_scale, roi[4] * spatial_scale)
        bin_w = (x2 - x1) / pool_size
        bin_h = (y2 - y1) / pool_size
        xs = x1 + (jnp.arange(pool_size, dtype=jnp.float32) + 0.5) * bin_w
        ys = y1 + (jnp.arange(pool_size, dtype=jnp.float32) + 0.5) * bin_h
        yy = ys[:, None]
        xx = xs[None, :]
        y0 = jnp.floor(yy)
        x0 = jnp.floor(xx)
        ly = yy - y0
        lx = xx - x0
        y0i = jnp.clip(y0, 0, H - 1).astype(jnp.int32)
        y1i = jnp.clip(y0 + 1, 0, H - 1).astype(jnp.int32)
        x0i = jnp.clip(x0, 0, W - 1).astype(jnp.int32)
        x1i = jnp.clip(x0 + 1, 0, W - 1).astype(jnp.int32)
        fmap = fmaps_hwc[b]                                   # [H, W, C]
        v00 = fmap[y0i, x0i]                                  # [P, P, C]
        v01 = fmap[y0i, x1i]
        v10 = fmap[y1i, x0i]
        v11 = fmap[y1i, x1i]
        w00 = ((1 - ly) * (1 - lx))[:, :, None]
        w01 = ((1 - ly) * lx)[:, :, None]
        w10 = (ly * (1 - lx))[:, :, None]
        w11 = (ly * lx)[:, :, None]
        return v00 * w00 + v01 * w01 + v10 * w10 + v11 * w11  # [P, P, C]

    return jax.vmap(one)(rois)


# -----------------------------------------------------------------------------
# Forward pass (mode='sgcls', conf.debug_type='test1_1')
# -----------------------------------------------------------------------------
def dynamic_filter_context_forward(params, fmaps, obj_logits, im_inds, rel_inds,
                                   boxes_priors):
    P = params["pooling_size"]
    P2 = P * P
    D = params["reduce_dim"]
    HID = params["hidden_dim"]
    NC = params["num_classes"]
    NR = params["num_rels"]

    N = obj_logits.shape[0]
    R = rel_inds.shape[0]
    RB = 8                               # relations per dynfilter grid step
    N_pad = _round_up(N, 8)
    R_pad = _round_up(R, RB)

    rois = jnp.concatenate(
        [im_inds[:, None].astype(jnp.float32), boxes_priors], axis=1)

    # obj_feature_map: RoIAlign (glue), NHWC so downstream flattens need no transpose
    fmaps_hwc = jnp.transpose(fmaps, (0, 2, 3, 1))
    obj_fmaps = roi_align_nhwc(fmaps_hwc, rois, P, 1.0 / 16.0)   # [N, P, P, C]
    C = obj_fmaps.shape[-1]
    obj_fmaps = _pad_rows(obj_fmaps, N_pad)                      # [N_pad, P, P, C]

    # reduce_obj_fmaps: 1x1 Conv2d(C -> reduce_dim) as an M-tiled Pallas matmul
    x_sp = obj_fmaps.reshape(N_pad * P2, C)
    red = pallas_linear(x_sp, params["conv_w"], params["conv_b"],
                        tile_m=min(128, N_pad * P2))
    reduce_trans = red.reshape(N_pad, P2, D)                     # == *_fmaps_trans

    S = _pad_rows(reduce_trans[rel_inds[:, 1]], R_pad)           # [R_pad, P2, D]
    O = _pad_rows(reduce_trans[rel_inds[:, 2]], R_pad)           # [R_pad, P2, D]

    # similar_fun + softmax(dim=1) + weighted matmul (Pallas, Rb-batched)
    weighted = pallas_dynfilter(S, O, params["sim_w1s"], params["sim_w1o"],
                                params["sim_b1"], params["sim_w2"], rb=RB)

    # fused object head: roi_fmap_obj -> [obj_compress | post_obj]
    obj_flat = obj_fmaps.reshape(N_pad, P2 * C)                  # spatial-major flatten
    heads = pallas_obj_head(obj_flat, params["rfo_w1"], params["rfo_b1"],
                            params["rfo_w2"], params["rfo_b2"],
                            params["head_w"], params["head_b"],
                            tile_m=8, tile_k=min(512, P2 * C))
    new_obj_logits = heads[:N, :NC]
    subobj_rep = heads[:N, NC:NC + 2 * HID]
    obj_dists = jax.nn.softmax(new_obj_logits, axis=1)
    pred_obj_cls = jnp.argmax(obj_dists[:, 1:], axis=1) + 1

    # fused relation head: roi_fmap (split into weighted/O halves) -> reduce_rel_input
    w_flat = weighted.reshape(R_pad, P2 * D)
    o_flat = O.reshape(R_pad, P2 * D)
    last_rel_input = pallas_rel_head(
        w_flat, o_flat, params["rf_w1w"], params["rf_w1o"], params["rf_b1"],
        params["rf_w2"], params["rf_b2"], params["rri_w"], params["rri_b"],
        tile_m=8, tile_k=min(256, P2 * D))                       # [R_pad, 3H padded]

    # post_obj split into subject / object representations
    sub_rep = subobj_rep[:, :HID][rel_inds[:, 1]]
    obj_rep = subobj_rep[:, HID:][rel_inds[:, 2]]
    so_rep = _pad_rows(jnp.concatenate([sub_rep, obj_rep], axis=1), R_pad)

    # frequency bias (sgcls: predicted classes); rows gathered here, added in-kernel
    pair_idx = pred_obj_cls[rel_inds[:, 1]] * NC + pred_obj_cls[rel_inds[:, 2]]
    freq_rows = _pad_rows(params["freq_bias"][pair_idx], R_pad)

    rel_logits_pad = pallas_triple_head(
        so_rep, last_rel_input, freq_rows, params["mapx_w"], params["mapx_b"],
        params["relc_w"], params["relc_b"], tile_m=8)
    rel_logits = rel_logits_pad[:R, :NR]

    return pred_obj_cls, new_obj_logits, rel_logits


# -----------------------------------------------------------------------------
# Deterministic parameter init (xavier-normal weights, zero biases)
# -----------------------------------------------------------------------------
def xavier(key, shape, fan_in=None, fan_out=None):
    fi = shape[0] if fan_in is None else fan_in
    fo = shape[1] if fan_out is None else fan_out
    std = (2.0 / (fi + fo)) ** 0.5
    return std * jax.random.normal(key, shape, dtype=jnp.float32)


def build_params(key, *, num_classes, num_rels, c_fm, pool, reduce_dim,
                 pooling_dim, hidden_dim):
    P2 = pool * pool
    HID3 = 3 * hidden_dim
    HID3_P = _round_up(HID3, 128)
    NR_P = _round_up(num_rels, 128)
    NH = num_classes + 2 * hidden_dim
    NH_P = _round_up(NH, 128)
    bf16 = jnp.bfloat16
    ks = jax.random.split(key, 16)

    # fused [obj_compress | post_obj] head, zero-padded to a 128-lane-dense slab
    head_w = jnp.concatenate(
        [xavier(ks[6], (pooling_dim, num_classes)),
         xavier(ks[9], (pooling_dim, 2 * hidden_dim))], axis=1)
    head_w = _pad_to(head_w, (pooling_dim, NH_P))

    params = {
        "pooling_size": pool,
        "reduce_dim": reduce_dim,
        "hidden_dim": hidden_dim,
        "num_classes": num_classes,
        "num_rels": num_rels,
        # 1x1 conv (stored [C_in, C_out])
        "conv_w": xavier(ks[0], (c_fm, reduce_dim)).astype(bf16),
        "conv_b": jnp.zeros((reduce_dim,), jnp.float32),
        # similar_fun: Linear(2D -> D) split into S / O column-halves; Linear(D -> 1)
        # weight only (its bias is dropped: softmax over i is shift-invariant).
        "sim_w1s": xavier(ks[1], (reduce_dim, reduce_dim),
                          fan_in=2 * reduce_dim, fan_out=reduce_dim),
        "sim_w1o": xavier(ks[2], (reduce_dim, reduce_dim),
                          fan_in=2 * reduce_dim, fan_out=reduce_dim),
        "sim_b1": jnp.zeros((reduce_dim,), jnp.float32),
        "sim_w2": xavier(ks[3], (reduce_dim, 1)).reshape(reduce_dim),
        # roi_fmap_obj (weight rows stored spatial-major: fixed row-permutation of
        # PyTorch's channel-major flatten; equivalent under our own init)
        "rfo_w1": xavier(ks[4], (P2 * c_fm, pooling_dim)).astype(bf16),
        "rfo_b1": jnp.zeros((pooling_dim,), jnp.float32),
        "rfo_w2": xavier(ks[5], (pooling_dim, pooling_dim)).astype(bf16),
        "rfo_b2": jnp.zeros((pooling_dim,), jnp.float32),
        "head_w": head_w.astype(bf16),
        "head_b": jnp.zeros((NH_P,), jnp.float32),
        # roi_fmap first Linear split into weighted-S / O halves (spatial-major rows)
        "rf_w1w": xavier(ks[7], (P2 * reduce_dim, pooling_dim),
                         fan_in=2 * reduce_dim * P2,
                         fan_out=pooling_dim).astype(bf16),
        "rf_w1o": xavier(ks[14], (P2 * reduce_dim, pooling_dim),
                         fan_in=2 * reduce_dim * P2,
                         fan_out=pooling_dim).astype(bf16),
        "rf_b1": jnp.zeros((pooling_dim,), jnp.float32),
        "rf_w2": xavier(ks[8], (pooling_dim, pooling_dim)).astype(bf16),
        "rf_b2": jnp.zeros((pooling_dim,), jnp.float32),
        # reduce_rel_input / mapping_x / rel_compress, 3*hidden and num_rels dims
        # zero-padded to 128 lanes (padding is exactly zero end-to-end)
        "rri_w": _pad_to(xavier(ks[11], (pooling_dim, HID3)),
                         (pooling_dim, HID3_P)).astype(bf16),
        "rri_b": jnp.zeros((HID3_P,), jnp.float32),
        "mapx_w": _pad_to(xavier(ks[10], (2 * hidden_dim, HID3)),
                          (2 * hidden_dim, HID3_P)).astype(bf16),
        "mapx_b": jnp.zeros((HID3_P,), jnp.float32),
        "relc_w": _pad_to(xavier(ks[12], (HID3, num_rels)), (HID3_P, NR_P)),
        "relc_b": jnp.zeros((NR_P,), jnp.float32),
        # FrequencyBias embedding table [(num_classes)^2, num_rels] (lane-padded)
        "freq_bias": _pad_to(
            0.1 * jax.random.normal(ks[13], (num_classes * num_classes, num_rels),
                                    dtype=jnp.float32),
            (num_classes * num_classes, NR_P)),
    }
    return params


# -----------------------------------------------------------------------------
if __name__ == "__main__":
    key = jax.random.PRNGKey(0)

    # Small, module-consistent shapes.
    NUM_CLASSES = 9        # object classes (incl. background idx 0)
    NUM_REL_CLASSES = 12   # relation classes
    NUM_IMAGES = 2
    C_FM = 64              # feature-map channels (stands in for 512)
    FH = FW = 16           # feature-map spatial size
    POOL = 4               # pooling_size (stands in for 7)
    REDUCE_DIM = 32        # stands in for 256
    POOLING_DIM = 128      # fc dim (stands in for 4096)
    HIDDEN = 32            # hidden_dim (stands in for 256)
    NUM_OBJS = 6
    NUM_REL_PAIRS = 8

    k_par, k_fm, k_box, k_rel, k_log = jax.random.split(key, 5)

    params = build_params(k_par, num_classes=NUM_CLASSES,
                          num_rels=NUM_REL_CLASSES, c_fm=C_FM, pool=POOL,
                          reduce_dim=REDUCE_DIM, pooling_dim=POOLING_DIM,
                          hidden_dim=HIDDEN)

    fmaps = jax.random.normal(k_fm, (NUM_IMAGES, C_FM, FH, FW), jnp.float32)
    obj_logits_in = jax.random.normal(k_log, (NUM_OBJS, NUM_CLASSES), jnp.float32)
    im_inds = jnp.array([0, 0, 0, 1, 1, 1], jnp.int32)

    kb1, kb2 = jax.random.split(k_box)
    xy1 = jax.random.uniform(kb1, (NUM_OBJS, 2), minval=0.0, maxval=180.0)
    wh = jax.random.uniform(kb2, (NUM_OBJS, 2), minval=16.0, maxval=64.0)
    boxes_priors = jnp.concatenate([xy1, xy1 + wh], axis=1)   # (x1, y1, x2, y2)

    kr1, kr2 = jax.random.split(k_rel)
    subj = jax.random.randint(kr1, (NUM_REL_PAIRS,), 0, NUM_OBJS)
    obj = jax.random.randint(kr2, (NUM_REL_PAIRS,), 0, NUM_OBJS)
    rel_inds = jnp.stack([jnp.zeros_like(subj), subj, obj], axis=1)  # (im, s, o)

    pred_obj_cls, obj_logits_out, rel_logits = dynamic_filter_context_forward(
        params, fmaps, obj_logits_in, im_inds, rel_inds, boxes_priors)

    jax.block_until_ready((pred_obj_cls, obj_logits_out, rel_logits))

    assert pred_obj_cls.shape == (NUM_OBJS,)
    assert obj_logits_out.shape == (NUM_OBJS, NUM_CLASSES)
    assert rel_logits.shape == (NUM_REL_PAIRS, NUM_REL_CLASSES)
    assert bool(jnp.all(jnp.isfinite(obj_logits_out)))
    assert bool(jnp.all(jnp.isfinite(rel_logits)))
    print("KERNEL_OK")
</pallas_src>

<mosaic_0001>
module attributes {stable_mosaic.version = 11 : i64} {
  func.func @_linear_kernel(%arg0: i32, %arg1: memref<128x64xf32, #tpu.memory_space<vmem>>, %arg2: memref<64x32xbf16, #tpu.memory_space<vmem>>, %arg3: memref<1x32xf32, #tpu.memory_space<vmem>>, %arg4: memref<128x32xf32, #tpu.memory_space<vmem>>) attributes {dimension_semantics = [#tpu.dimension_semantics<parallel>], iteration_bounds = array<i64: 1>, scalar_prefetch = 0 : i64, scratch_operands = 0 : i64, tpu.core_type = #tpu.core_type<tc>, window_params = [{transform_indices = @transform_0, window_bounds = array<i64: 128, 64>}, {pipeline_mode = #tpu.pipeline_mode<synchronous>, transform_indices = @transform_1, window_bounds = array<i64: 64, 32>}, {pipeline_mode = #tpu.pipeline_mode<synchronous>, transform_indices = @transform_2, window_bounds = array<i64: 1, 32>}, {transform_indices = @transform_3, window_bounds = array<i64: 128, 32>}]} {
    %c0 = arith.constant 0 : index
    %c0_0 = arith.constant 0 : index
    %0 = vector.load %arg1[%c0, %c0_0] : memref<128x64xf32, #tpu.memory_space<vmem>>, vector<128x64xf32>
    %1 = arith.truncf %0 : vector<128x64xf32> to vector<128x64xbf16>
    %c0_1 = arith.constant 0 : index
    %c0_2 = arith.constant 0 : index
    %2 = vector.load %arg2[%c0_1, %c0_2] : memref<64x32xbf16, #tpu.memory_space<vmem>>, vector<64x32xbf16>
    %cst = arith.constant dense<0.000000e+00> : vector<128x32xf32>
    %3 = tpu.matmul %1, %2, %cst {dimension_numbers = #tpu.dot_dimension_numbers<[1], [0], [0], [1], [0, 0, 1, 1], [], []>} : vector<128x64xbf16>, vector<64x32xbf16>, vector<128x32xf32> -> vector<128x32xf32>
    %c0_3 = arith.constant 0 : index
    %c0_4 = arith.constant 0 : index
    %4 = vector.load %arg3[%c0_3, %c0_4] : memref<1x32xf32, #tpu.memory_space<vmem>>, vector<1x32xf32>
    %5 = vector.broadcast %4 : vector<1x32xf32> to vector<128x32xf32>
    %6 = arith.addf %3, %5 : vector<128x32xf32>
    %c0_5 = arith.constant 0 : index
    %c0_6 = arith.constant 0 : index
    %7 = vector.load %arg4[%c0_5, %c0_6] : memref<128x32xf32, #tpu.memory_space<vmem>>, vector<128x32xf32>
    tpu.vector_store %arg4[%c0_5, %c0_6], %6 {strides = array<i32>} : memref<128x32xf32, #tpu.memory_space<vmem>>, vector<128x32xf32>,
    return
  }
  func.func @transform_0(%arg0: i32) -> (i32, i32) {
    %c0_i32 = arith.constant 0 : i32
    %c0_i32_0 = arith.constant 0 : i32
    return %arg0, %c0_i32 : i32, i32
  }
  func.func @transform_1(%arg0: i32) -> (i32, i32) {
    %c0_i32 = arith.constant 0 : i32
    %c0_i32_0 = arith.constant 0 : i32
    %c0_i32_1 = arith.constant 0 : i32
    return %c0_i32, %c0_i32_0 : i32, i32
  }
  func.func @transform_2(%arg0: i32) -> (i32, i32) {
    %c0_i32 = arith.constant 0 : i32
    %c0_i32_0 = arith.constant 0 : i32
    %c0_i32_1 = arith.constant 0 : i32
    return %c0_i32, %c0_i32_0 : i32, i32
  }
  func.func @transform_3(%arg0: i32) -> (i32, i32) {
    %c0_i32 = arith.constant 0 : i32
    %c0_i32_0 = arith.constant 0 : i32
    return %arg0, %c0_i32 : i32, i32
  }
}

</mosaic_0001>

<bundles_post_ra>
// kernel: tpu_custom_call.1
= control target key start
LH: loop header
LB: loop body
LE: loop exit
PB: predicated region body
PF: predicated region fallthrough
CT: control target
= control target key end

     0   :  { %vm75_vm0 = vcmask 523264   ;;  %vm149_vm1 = vcmask 261120   ;;  %s366_s1 = inlined_call_operand.vmem [shape: bf16[64,32], index: 1, kind: input, shape index: {}]   ;;  %s367_s2 = inlined_call_operand.vmem [shape: f32[1,32], index: 2, kind: input, shape index: {}]   ;;  %s368_s0 = inlined_call_operand.vmem [shape: f32[128,64], index: 0, kind: input, shape index: {}]   ;;  %s369_s3 = inlined_call_operand.vmem [shape: f32[128,32], index: 3, kind: output, shape index: {}]  }
   0x1   :  { %v197_v0 = vld [vmem:[%s366_s1 + $0x18] sm:$0xff]  ;;  %v196_v1 = vld [vmem:[%s366_s1 + $0x10] sm:$0xff]  ;;  %v195_v2 = vld [vmem:[%s366_s1 + $0x8] sm:$0xff] }
   0x2   :  { %104 = vmatpush.bf16.msra.mxu0 %v197_v0  ;;  %198 = vmatpush.bf16.msra.mxu1 %v197_v0  ;;  %v194_v3 = vld [vmem:[%s366_s1] sm:$0xff]  ;;  %v16_v5 = vld [vmem:[%s368_s0 + $0x8] sm:$0xff]  ;;  %v17_v16 = vld [vmem:[%s368_s0 + $0x10] sm:$0xff] }
   0x3   :  { %199 = vmatpush.bf16.msra.mxu2 %v197_v0  ;;  %200 = vmatpush.bf16.msra.mxu3 %v197_v0  ;;  %v15_v4 = vld [vmem:[%s368_s0] sm:$0xff]  ;;  %v20_v7 = vld [vmem:[%s368_s0 + $0x28] sm:$0xff]  ;;  %v18_v17 = vld [vmem:[%s368_s0 + $0x18] sm:$0xff] }
   0x4   :  { %v19_v6 = vld [vmem:[%s368_s0 + $0x20] sm:$0xff]  ;;  %v24_v9 = vld [vmem:[%s368_s0 + $0x48] sm:$0xff]  ;;  %v31_v12 = vpack.c.bf16 %v16_v5, %v15_v4  ;;  %v21_v18 = vld [vmem:[%s368_s0 + $0x30] sm:$0xff]  ;;  %v32_v24 = vpack.c.bf16 %v18_v17, %v17_v16 }
   0x5   :  { %v23_v8 = vld [vmem:[%s368_s0 + $0x40] sm:$0xff]  ;;  %v28_v11 = vld [vmem:[%s368_s0 + $0x68] sm:$0xff]  ;;  %v33_v13 = vpack.c.bf16 %v20_v7, %v19_v6  ;;  %v22_v19 = vld [vmem:[%s368_s0 + $0x38] sm:$0xff] }
   0x6   :  { %105 = vmatpush.bf16.msra.mxu0 %v196_v1  ;;  %201 = vmatpush.bf16.msra.mxu1 %v196_v1  ;;  %v27_v10 = vld [vmem:[%s368_s0 + $0x60] sm:$0xff]  ;;  %v35_v14 = vpack.c.bf16 %v24_v9, %v23_v8  ;;  %v25_v20 = vld [vmem:[%s368_s0 + $0x50] sm:$0xff]  ;;  %v26_v21 = vld [vmem:[%s368_s0 + $0x58] sm:$0xff]  ;;  %v34_v25 = vpack.c.bf16 %v22_v19, %v21_v18 }
   0x7   :  { %202 = vmatpush.bf16.msra.mxu2 %v196_v1  ;;  %203 = vmatpush.bf16.msra.mxu3 %v196_v1  ;;  %v37_v15 = vpack.c.bf16 %v28_v11, %v27_v10  ;;  %v29_v22 = vld [vmem:[%s368_s0 + $0x70] sm:$0xff]  ;;  %v30_v23 = vld [vmem:[%s368_s0 + $0x78] sm:$0xff]  ;;  %v36_v26 = vpack.c.bf16 %v26_v21, %v25_v20  ;;  %v210_v28 = vld [vmem:[%s367_s2] ss:$0 sm:$0xff] }
   0x8   :  { %v38_v27 = vpack.c.bf16 %v30_v23, %v29_v22 }
   0xa   :  { %106 = vmatpush.bf16.msra.mxu0 %v195_v2  ;;  %204 = vmatpush.bf16.msra.mxu1 %v195_v2 }
   0xb   :  { %205 = vmatpush.bf16.msra.mxu2 %v195_v2  ;;  %206 = vmatpush.bf16.msra.mxu3 %v195_v2 }
   0xe   :  { %107 = vmatpush.bf16.msra.mxu0 %v194_v3  ;;  %207 = vmatpush.bf16.msra.mxu1 %v194_v3 }
   0xf   :  { %208 = vmatpush.bf16.msra.mxu2 %v194_v3  ;;  %209 = vmatpush.bf16.msra.mxu3 %v194_v3 }
  0x11   :  { %186 = vmatmul.msk.bf16.vlgmr.msra.gmra.mxu0 %vm75_vm0, %v31_v12  ;;  %188 = vmatmul.msk.bf16.vlgmr.msra.gmra.mxu1 %vm75_vm0, %v33_v13 }
  0x12   :  { %190 = vmatmul.msk.bf16.vlgmr.msra.gmra.mxu2 %vm75_vm0, %v35_v14  ;;  %192 = vmatmul.msk.bf16.vlgmr.msra.gmra.mxu3 %vm75_vm0, %v37_v15 }
  0x21   :  { %187 = vmatmul.msk.bf16.gmra.mxu0 %vm75_vm0, %v32_v24  ;;  %189 = vmatmul.msk.bf16.gmra.mxu1 %vm75_vm0, %v34_v25 }
  0x22   :  { %191 = vmatmul.msk.bf16.gmra.mxu2 %vm75_vm0, %v36_v26  ;;  %193 = vmatmul.msk.bf16.gmra.mxu3 %vm75_vm0, %v38_v27 }
  0x8e   :  { %v109_v29 = vpop.f32.mrf.mxu0  ;;  %v119_v30 = vpop.f32.mrf.mxu1 }
  0x8f   :  { %v110_v31 = vadd.f32 %v210_v28, %v109_v29  ;;  %v120_v32 = vadd.f32 %v210_v28, %v119_v30 }
  0x91   :  { %150 = vst.msk [vmem:[%s369_s3] sm:$0xff] %vm149_vm1, %v110_v31 }
  0x92   :  { %154 = vst.msk [vmem:[%s369_s3 + $0x20] sm:$0xff] %vm149_vm1, %v120_v32 }
  0x95   :  { %v129_v33 = vpop.f32.mrf.mxu2  ;;  %v139_v34 = vpop.f32.mrf.mxu3 }
  0x96   :  { %v130_v35 = vadd.f32 %v210_v28, %v129_v33  ;;  %v140_v36 = vadd.f32 %v210_v28, %v139_v34  ;;  %v111_v37 = vpop.f32.mrf.mxu0  ;;  %v121_v38 = vpop.f32.mrf.mxu1 }
  0x97   :  { %v112_v39 = vadd.f32 %v210_v28, %v111_v37  ;;  %v122_v40 = vadd.f32 %v210_v28, %v121_v38 }
  0x98   :  { %158 = vst.msk [vmem:[%s369_s3 + $0x40] sm:$0xff] %vm149_vm1, %v130_v35 }
  0x99   :  { %162 = vst.msk [vmem:[%s369_s3 + $0x60] sm:$0xff] %vm149_vm1, %v140_v36 }
  0x9a   :  { %151 = vst.msk [vmem:[%s369_s3 + $0x8] sm:$0xff] %vm149_vm1, %v112_v39 }
  0x9b   :  { %155 = vst.msk [vmem:[%s369_s3 + $0x28] sm:$0xff] %vm149_vm1, %v122_v40 }
  0x9d   :  { %v131_v41 = vpop.f32.mrf.mxu2  ;;  %v141_v42 = vpop.f32.mrf.mxu3 }
  0x9e   :  { %v132_v43 = vadd.f32 %v210_v28, %v131_v41  ;;  %v142_v44 = vadd.f32 %v210_v28, %v141_v42  ;;  %v114_v45 = vpop.f32.mrf.mxu0  ;;  %v124_v46 = vpop.f32.mrf.mxu1 }
  0x9f   :  { %v115_v47 = vadd.f32 %v210_v28, %v114_v45  ;;  %v125_v48 = vadd.f32 %v210_v28, %v124_v46 }
  0xa0   :  { %159 = vst.msk [vmem:[%s369_s3 + $0x48] sm:$0xff] %vm149_vm1, %v132_v43 }
  0xa1   :  { %163 = vst.msk [vmem:[%s369_s3 + $0x68] sm:$0xff] %vm149_vm1, %v142_v44 }
  0xa2   :  { %152 = vst.msk [vmem:[%s369_s3 + $0x10] sm:$0xff] %vm149_vm1, %v115_v47 }
  0xa3   :  { %156 = vst.msk [vmem:[%s369_s3 + $0x30] sm:$0xff] %vm149_vm1, %v125_v48 }
  0xa5   :  { %v134_v49 = vpop.f32.mrf.mxu2  ;;  %v144_v50 = vpop.f32.mrf.mxu3 }
  0xa6   :  { %v135_v51 = vadd.f32 %v210_v28, %v134_v49  ;;  %v145_v52 = vadd.f32 %v210_v28, %v144_v50  ;;  %v116_v53 = vpop.f32.mrf.mxu0  ;;  %v126_v54 = vpop.f32.mrf.mxu1 }
  0xa7   :  { %v117_v55 = vadd.f32 %v210_v28, %v116_v53  ;;  %v127_v56 = vadd.f32 %v210_v28, %v126_v54 }
  0xa8   :  { %160 = vst.msk [vmem:[%s369_s3 + $0x50] sm:$0xff] %vm149_vm1, %v135_v51 }
  0xa9   :  { %164 = vst.msk [vmem:[%s369_s3 + $0x70] sm:$0xff] %vm149_vm1, %v145_v52 }
  0xaa   :  { %153 = vst.msk [vmem:[%s369_s3 + $0x18] sm:$0xff] %vm149_vm1, %v117_v55 }
  0xab   :  { %157 = vst.msk [vmem:[%s369_s3 + $0x38] sm:$0xff] %vm149_vm1, %v127_v56 }
  0xad   :  { %v136_v57 = vpop.f32.mrf.mxu2  ;;  %v146_v58 = vpop.f32.mrf.mxu3 }
  0xae   :  { %v137_v59 = vadd.f32 %v210_v28, %v136_v57  ;;  %v147_v60 = vadd.f32 %v210_v28, %v146_v58 }
  0xb0   :  { %161 = vst.msk [vmem:[%s369_s3 + $0x58] sm:$0xff] %vm149_vm1, %v137_v59 }
  0xb1   :  { %165 = vst.msk [vmem:[%s369_s3 + $0x78] sm:$0xff] %vm149_vm1, %v147_v60 }

</bundles_post_ra>
